<compile_context>
chip_gen: v5e
topology: v5e:2x2
jax: 0.10.0
libtpu: 0.0.40
codegen_flags: <defaults>
</compile_context>

<pallas_src>
import functools

import jax
import jax.numpy as jnp
from jax.experimental import pallas as pl
from jax.experimental.pallas import tpu as pltpu

LANE = 128


def _round_up(x, m):
    return (x + m - 1) // m * m


def _make_ocgnn_kernel(num_layers, score_col, fused_score):
    """Fused GCN stack + hypersphere score.

    h_1     = relu(A_norm @ XW0 + b_0)                       (XW0 precomputed)
    h_{l+1} = relu(A_norm @ (h_l @ W_l) + b_l)               (no ReLU on last layer)
    score_i = ||h_L[i] - c||^2 - r^2                         (fused epilogue)
    """
    n_w = num_layers - 1  # W0 is applied in the wrapper

    def kernel(*refs):
        a_ref, xw0_ref = refs[0], refs[1]
        w_refs = refs[2:2 + n_w]
        consts_ref = refs[2 + n_w]
        out_refs = refs[3 + n_w:]

        a = a_ref[...]                       # bf16 [Np, Np]
        consts = consts_ref[...]             # f32  [8, Hp] (biases, center, r^2)

        # Layer 0: neighborhood aggregation of the pre-transformed features.
        h = jnp.dot(a, xw0_ref[...], preferred_element_type=jnp.float32)
        h = h + consts[0:1, :]
        if num_layers > 1:
            h = jnp.maximum(h, 0.0)

        for l in range(1, num_layers):
            # Feature transform then aggregation, both on the MXU (bf16 -> f32 acc).
            hw = jnp.dot(h.astype(jnp.bfloat16), w_refs[l - 1][...],
                         preferred_element_type=jnp.float32)      # [Np, Hp]
            h = jnp.dot(a, hw.astype(jnp.bfloat16),
                        preferred_element_type=jnp.float32)        # [Np, Hp]
            h = h + consts[l:l + 1, :]
            if l < num_layers - 1:
                h = jnp.maximum(h, 0.0)

        # Fused OCGNN hypersphere score: ||h - c||^2 - r^2.
        c = consts[num_layers:num_layers + 1, :]                   # (1, Hp)
        r2 = consts[num_layers + 1:num_layers + 2, 0:1]            # (1, 1)
        d = h - c
        score = jnp.sum(d * d, axis=-1, keepdims=True) - r2        # (Np, 1) f32

        if fused_score:
            # Single lane-dense 128-wide store: score rides in spare lane `hid`.
            out_ref, = out_refs
            lane = jax.lax.broadcasted_iota(jnp.int32, h.shape, 1)
            out_ref[...] = jnp.where(lane == score_col, score, h)
        else:
            out_ref, score_ref = out_refs
            out_ref[...] = h
            score_ref[...] = jnp.broadcast_to(score, score_ref.shape)

    return kernel


@functools.partial(jax.jit, static_argnames=("radius",))
def ocgnn_forward(a_norm, x, params, center, radius):
    """Forward pass of OCGNN's GCN backbone + hypersphere score.

    a_norm : [N, N] f32 normalized dense adjacency (D^-1/2 (A+I) D^-1/2)
    x      : [N, F] f32 node features
    params : list of (W_l, b_l), W0: [F, H], W_l: [H, H], b_l: [H]
    center : [H] f32 hypersphere center
    radius : python float radius (static under jit)
    Returns (emb [N, H] f32, score [N] f32).
    """
    N, _ = x.shape
    hid = params[-1][0].shape[1]
    num_layers = len(params)

    n_pad = _round_up(N, LANE)
    h_pad = _round_up(hid, LANE)

    def pad2(m, r, c):
        return jnp.pad(m, ((0, r - m.shape[0]), (0, c - m.shape[1])))

    # bf16 MXU operands; cast BEFORE padding (halves pad bytes moved).
    a_p = pad2(a_norm.astype(jnp.bfloat16), n_pad, n_pad)

    # Layer-0 feature transform hoisted to the wrapper (tiny unpadded matmul).
    w0 = params[0][0]
    xw0 = jnp.dot(x.astype(jnp.bfloat16), w0.astype(jnp.bfloat16),
                  preferred_element_type=jnp.float32).astype(jnp.bfloat16)
    xw0_p = pad2(xw0, n_pad, h_pad)

    w_ps = [pad2(w.astype(jnp.bfloat16), h_pad, h_pad) for (w, _) in params[1:]]

    # Pack biases (rows 0..L-1), center (row L) and r^2 (row L+1, lane 0) into a
    # single lane-dense f32 slab with ONE concatenate.
    rows = [jnp.pad(b.astype(jnp.float32), (0, h_pad - b.shape[0]))[None, :]
            for (_, b) in params]
    rows.append(jnp.pad(center.astype(jnp.float32), (0, h_pad - hid))[None, :])
    rows.append(jnp.pad(jnp.full((1, 1), float(radius) ** 2, jnp.float32),
                        ((0, 0), (0, h_pad - 1))))
    n_rows = _round_up(len(rows), 8)
    if n_rows > len(rows):
        rows.append(jnp.zeros((n_rows - len(rows), h_pad), jnp.float32))
    consts = jnp.concatenate(rows, axis=0)

    fused_score = hid < h_pad          # spare padded lane available for the score
    score_col = hid
    kernel = _make_ocgnn_kernel(num_layers, score_col, fused_score)
    vmem = pl.BlockSpec(memory_space=pltpu.MemorySpace.VMEM)

    n_in = 2 + len(w_ps) + 1
    if fused_score:
        out_shape = jax.ShapeDtypeStruct((n_pad, h_pad), jnp.float32)
        out_specs = vmem
    else:
        out_shape = (jax.ShapeDtypeStruct((n_pad, h_pad), jnp.float32),
                     jax.ShapeDtypeStruct((n_pad, LANE), jnp.float32))
        out_specs = (vmem, vmem)

    out = pl.pallas_call(
        kernel,
        out_shape=out_shape,
        in_specs=[vmem] * n_in,
        out_specs=out_specs,
    )(a_p, xw0_p, *w_ps, consts)

    if fused_score:
        emb = out[:N, :hid]
        score = out[:N, score_col]
    else:
        emb = out[0][:N, :hid]
        score = out[1][:N, 0]
    return emb, score


def build_normalized_adjacency(edge_index, num_nodes):
    """Dense D^-1/2 (A + I) D^-1/2 (PyG gcn_norm with self-loops)."""
    A = jnp.zeros((num_nodes, num_nodes), jnp.float32)
    A = A.at[edge_index[0], edge_index[1]].set(1.0)
    A = jnp.maximum(A, jnp.eye(num_nodes, dtype=jnp.float32))  # add self-loops
    deg = A.sum(axis=1)
    dinv = jax.lax.rsqrt(deg)
    return dinv[:, None] * A * dinv[None, :]


def init_gcn_params(key, in_dim, hid_dim, num_layers=4):
    """Deterministic glorot-uniform weights, zero biases (PyG GCNConv defaults)."""
    params = []
    dims = [in_dim] + [hid_dim] * num_layers
    for l in range(num_layers):
        key, sub = jax.random.split(key)
        fan_in, fan_out = dims[l], dims[l + 1]
        lim = jnp.sqrt(6.0 / (fan_in + fan_out))
        w = jax.random.uniform(sub, (fan_in, fan_out), jnp.float32, -lim, lim)
        b = jnp.zeros((fan_out,), jnp.float32)
        params.append((w, b))
    return params


def ocgnn_reference(a_norm, x, params, center, radius):
    """Pure-JAX reference following the same bf16-operand / f32-accumulate path."""
    a = a_norm.astype(jnp.bfloat16)
    h = x.astype(jnp.bfloat16)
    for l, (w, b) in enumerate(params):
        hw = jnp.dot(h.astype(jnp.bfloat16), w.astype(jnp.bfloat16),
                     preferred_element_type=jnp.float32)
        h = jnp.dot(a, hw.astype(jnp.bfloat16),
                    preferred_element_type=jnp.float32) + b
        if l < len(params) - 1:
            h = jnp.maximum(h, 0.0)
    dist = jnp.sum((h - center[None, :]) ** 2, axis=1)
    score = dist - float(radius) ** 2
    return h, score


if __name__ == "__main__":
    key = jax.random.PRNGKey(0)

    N = 64         # number of nodes
    in_dim = 32    # input feature dim
    hid_dim = 64   # hidden / output dim (OCGNN default hid_dim=64)
    num_layers = 4
    beta = 0.5

    # Node features
    key, kx = jax.random.split(key)
    x = jax.random.normal(kx, (N, in_dim), jnp.float32)

    # Deterministic graph: ring + a few random undirected edges
    ring_src = jnp.arange(N)
    ring_dst = (ring_src + 1) % N
    key, ke = jax.random.split(key)
    rnd_src = jax.random.randint(ke, (32,), 0, N)
    key, ke2 = jax.random.split(key)
    rnd_dst = jax.random.randint(ke2, (32,), 0, N)
    src = jnp.concatenate([ring_src, ring_dst, rnd_src, rnd_dst])
    dst = jnp.concatenate([ring_dst, ring_src, rnd_dst, rnd_src])
    edge_index = jnp.stack([src, dst])

    a_norm = build_normalized_adjacency(edge_index, N)

    # Deterministic parameters (GCN backbone: in->hid, hid->hid x3)
    params = init_gcn_params(jax.random.PRNGKey(0), in_dim, hid_dim, num_layers)

    # Deterministic hypersphere center / radius (normally set during training).
    key, kc = jax.random.split(key)
    center = 0.1 * jax.random.normal(kc, (hid_dim,), jnp.float32)
    radius = 0.8

    emb, score = ocgnn_forward(a_norm, x, params, center, radius)
    emb = jax.block_until_ready(emb)
    score = jax.block_until_ready(score)

    ref_emb, ref_score = ocgnn_reference(a_norm, x, params, center, radius)

    assert emb.shape == (N, hid_dim)
    assert score.shape == (N,)
    assert jnp.allclose(emb, ref_emb, atol=1e-2, rtol=1e-2), "embedding mismatch"
    assert jnp.allclose(score, ref_score, atol=1e-1, rtol=1e-2), "score mismatch"

    # OCGNN loss from the fused per-node score (scalar epilogue, trivial in JAX).
    loss = radius ** 2 + (1.0 / beta) * jnp.mean(jnp.maximum(score, 0.0))
    _ = jax.block_until_ready(loss)

    print("KERNEL_OK")
</pallas_src>

<mosaic_0001>
module attributes {stable_mosaic.version = 11 : i64} {
  func.func @kernel(%arg0: memref<128x128xbf16, #tpu.memory_space<vmem>>, %arg1: memref<128x128xbf16, #tpu.memory_space<vmem>>, %arg2: memref<128x128xbf16, #tpu.memory_space<vmem>>, %arg3: memref<128x128xbf16, #tpu.memory_space<vmem>>, %arg4: memref<128x128xbf16, #tpu.memory_space<vmem>>, %arg5: memref<8x128xf32, #tpu.memory_space<vmem>>, %arg6: memref<128x128xf32, #tpu.memory_space<vmem>>) attributes {dimension_semantics = [], scalar_prefetch = 0 : i64, scratch_operands = 0 : i64, tpu.core_type = #tpu.core_type<tc>} {
    %c0 = arith.constant 0 : index
    %c0_0 = arith.constant 0 : index
    %0 = vector.load %arg0[%c0, %c0_0] : memref<128x128xbf16, #tpu.memory_space<vmem>>, vector<128x128xbf16>
    %c0_1 = arith.constant 0 : index
    %c0_2 = arith.constant 0 : index
    %1 = vector.load %arg5[%c0_1, %c0_2] : memref<8x128xf32, #tpu.memory_space<vmem>>, vector<8x128xf32>
    %c0_3 = arith.constant 0 : index
    %c0_4 = arith.constant 0 : index
    %2 = vector.load %arg1[%c0_3, %c0_4] : memref<128x128xbf16, #tpu.memory_space<vmem>>, vector<128x128xbf16>
    %cst = arith.constant dense<0.000000e+00> : vector<128x128xf32>
    %3 = tpu.matmul %0, %2, %cst {dimension_numbers = #tpu.dot_dimension_numbers<[1], [0], [0], [1], [0, 0, 1, 1], [], []>} : vector<128x128xbf16>, vector<128x128xbf16>, vector<128x128xf32> -> vector<128x128xf32>
    %4 = vector.extract_strided_slice %1 {offsets = [0, 0], sizes = [1, 128], strides = [1, 1]} : vector<8x128xf32> to vector<1x128xf32>
    %5 = vector.broadcast %4 : vector<1x128xf32> to vector<128x128xf32>
    %6 = arith.addf %3, %5 : vector<128x128xf32>
    %cst_5 = arith.constant 0.000000e+00 : f32
    %7 = vector.broadcast %cst_5 : f32 to vector<128x128xf32>
    %8 = arith.maximumf %6, %7 : vector<128x128xf32>
    %9 = arith.truncf %8 : vector<128x128xf32> to vector<128x128xbf16>
    %c0_6 = arith.constant 0 : index
    %c0_7 = arith.constant 0 : index
    %10 = vector.load %arg2[%c0_6, %c0_7] : memref<128x128xbf16, #tpu.memory_space<vmem>>, vector<128x128xbf16>
    %cst_8 = arith.constant dense<0.000000e+00> : vector<128x128xf32>
    %11 = tpu.matmul %9, %10, %cst_8 {dimension_numbers = #tpu.dot_dimension_numbers<[1], [0], [0], [1], [0, 0, 1, 1], [], []>} : vector<128x128xbf16>, vector<128x128xbf16>, vector<128x128xf32> -> vector<128x128xf32>
    %12 = arith.truncf %11 : vector<128x128xf32> to vector<128x128xbf16>
    %cst_9 = arith.constant dense<0.000000e+00> : vector<128x128xf32>
    %13 = tpu.matmul %0, %12, %cst_9 {dimension_numbers = #tpu.dot_dimension_numbers<[1], [0], [0], [1], [0, 0, 1, 1], [], []>} : vector<128x128xbf16>, vector<128x128xbf16>, vector<128x128xf32> -> vector<128x128xf32>
    %14 = vector.extract_strided_slice %1 {offsets = [1, 0], sizes = [1, 128], strides = [1, 1]} : vector<8x128xf32> to vector<1x128xf32>
    %15 = vector.broadcast %14 : vector<1x128xf32> to vector<128x128xf32>
    %16 = arith.addf %13, %15 : vector<128x128xf32>
    %cst_10 = arith.constant 0.000000e+00 : f32
    %17 = vector.broadcast %cst_10 : f32 to vector<128x128xf32>
    %18 = arith.maximumf %16, %17 : vector<128x128xf32>
    %19 = arith.truncf %18 : vector<128x128xf32> to vector<128x128xbf16>
    %c0_11 = arith.constant 0 : index
    %c0_12 = arith.constant 0 : index
    %20 = vector.load %arg3[%c0_11, %c0_12] : memref<128x128xbf16, #tpu.memory_space<vmem>>, vector<128x128xbf16>
    %cst_13 = arith.constant dense<0.000000e+00> : vector<128x128xf32>
    %21 = tpu.matmul %19, %20, %cst_13 {dimension_numbers = #tpu.dot_dimension_numbers<[1], [0], [0], [1], [0, 0, 1, 1], [], []>} : vector<128x128xbf16>, vector<128x128xbf16>, vector<128x128xf32> -> vector<128x128xf32>
    %22 = arith.truncf %21 : vector<128x128xf32> to vector<128x128xbf16>
    %cst_14 = arith.constant dense<0.000000e+00> : vector<128x128xf32>
    %23 = tpu.matmul %0, %22, %cst_14 {dimension_numbers = #tpu.dot_dimension_numbers<[1], [0], [0], [1], [0, 0, 1, 1], [], []>} : vector<128x128xbf16>, vector<128x128xbf16>, vector<128x128xf32> -> vector<128x128xf32>
    %24 = vector.extract_strided_slice %1 {offsets = [2, 0], sizes = [1, 128], strides = [1, 1]} : vector<8x128xf32> to vector<1x128xf32>
    %25 = vector.broadcast %24 : vector<1x128xf32> to vector<128x128xf32>
    %26 = arith.addf %23, %25 : vector<128x128xf32>
    %cst_15 = arith.constant 0.000000e+00 : f32
    %27 = vector.broadcast %cst_15 : f32 to vector<128x128xf32>
    %28 = arith.maximumf %26, %27 : vector<128x128xf32>
    %29 = arith.truncf %28 : vector<128x128xf32> to vector<128x128xbf16>
    %c0_16 = arith.constant 0 : index
    %c0_17 = arith.constant 0 : index
    %30 = vector.load %arg4[%c0_16, %c0_17] : memref<128x128xbf16, #tpu.memory_space<vmem>>, vector<128x128xbf16>
    %cst_18 = arith.constant dense<0.000000e+00> : vector<128x128xf32>
    %31 = tpu.matmul %29, %30, %cst_18 {dimension_numbers = #tpu.dot_dimension_numbers<[1], [0], [0], [1], [0, 0, 1, 1], [], []>} : vector<128x128xbf16>, vector<128x128xbf16>, vector<128x128xf32> -> vector<128x128xf32>
    %32 = arith.truncf %31 : vector<128x128xf32> to vector<128x128xbf16>
    %cst_19 = arith.constant dense<0.000000e+00> : vector<128x128xf32>
    %33 = tpu.matmul %0, %32, %cst_19 {dimension_numbers = #tpu.dot_dimension_numbers<[1], [0], [0], [1], [0, 0, 1, 1], [], []>} : vector<128x128xbf16>, vector<128x128xbf16>, vector<128x128xf32> -> vector<128x128xf32>
    %34 = vector.extract_strided_slice %1 {offsets = [3, 0], sizes = [1, 128], strides = [1, 1]} : vector<8x128xf32> to vector<1x128xf32>
    %35 = vector.broadcast %34 : vector<1x128xf32> to vector<128x128xf32>
    %36 = arith.addf %33, %35 : vector<128x128xf32>
    %37 = vector.extract_strided_slice %1 {offsets = [4, 0], sizes = [1, 128], strides = [1, 1]} : vector<8x128xf32> to vector<1x128xf32>
    %38 = vector.extract_strided_slice %1 {offsets = [5, 0], sizes = [1, 1], strides = [1, 1]} : vector<8x128xf32> to vector<1x1xf32>
    %39 = vector.broadcast %37 : vector<1x128xf32> to vector<128x128xf32>
    %40 = arith.subf %36, %39 : vector<128x128xf32>
    %41 = arith.mulf %40, %40 : vector<128x128xf32>
    %cst_20 = arith.constant dense<0.000000e+00> : vector<128xf32>
    %42 = vector.multi_reduction <add>, %41, %cst_20 [1] : vector<128x128xf32> to vector<128xf32>
    %43 = vector.shape_cast %42 : vector<128xf32> to vector<128x1xf32>
    %44 = vector.broadcast %38 : vector<1x1xf32> to vector<128x1xf32>
    %45 = arith.subf %43, %44 : vector<128x1xf32>
    %46 = tpu.iota {dimensions = array<i32: 1>} : vector<128x128xi32>
    %c64_i32 = arith.constant 64 : i32
    %47 = vector.broadcast %c64_i32 : i32 to vector<128x128xi32>
    %48 = arith.cmpi eq, %46, %47 : vector<128x128xi32>
    %49 = vector.shape_cast %45 : vector<128x1xf32> to vector<128x1xf32>
    %50 = vector.broadcast %49 : vector<128x1xf32> to vector<128x128xf32>
    %51 = arith.select %48, %50, %36 : vector<128x128xi1>, vector<128x128xf32>
    %c0_21 = arith.constant 0 : index
    %c0_22 = arith.constant 0 : index
    %52 = vector.load %arg6[%c0_21, %c0_22] : memref<128x128xf32, #tpu.memory_space<vmem>>, vector<128x128xf32>
    tpu.vector_store %arg6[%c0_21, %c0_22], %51 {strides = array<i32>} : memref<128x128xf32, #tpu.memory_space<vmem>>, vector<128x128xf32>,
    return
  }
}

</mosaic_0001>

<bundles_post_ra>
// kernel: ocgnn_forward.1
= control target key start
LH: loop header
LB: loop body
LE: loop exit
PB: predicated region body
PF: predicated region fallthrough
CT: control target
= control target key end

     0   :  { %s1595_s1 = inlined_call_operand.vmem [shape: bf16[128,128], index: 1, kind: input, shape index: {}]   ;;  %s1596_s0 = inlined_call_operand.vmem [shape: bf16[128,128], index: 0, kind: input, shape index: {}]   ;;  %s1597_s2 = inlined_call_operand.vmem [shape: bf16[128,128], index: 2, kind: input, shape index: {}]   ;;  %s1598_s5 = inlined_call_operand.vmem [shape: f32[8,128], index: 5, kind: input, shape index: {}]   ;;  %s1599_s3 = inlined_call_operand.vmem [shape: bf16[128,128], index: 3, kind: input, shape index: {}]   ;;  %s1600_s4 = inlined_call_operand.vmem [shape: bf16[128,128], index: 4, kind: input, shape index: {}]   ;;  %s1601_s6 = inlined_call_operand.vmem [shape: f32[128,128], index: 6, kind: output, shape index: {}]  }
   0x1   :  { %v1163_v0 = vld [vmem:[%s1595_s1 + $0x38] sm:$0xff]  ;;  %v1162_v1 = vld [vmem:[%s1595_s1 + $0x30] sm:$0xff]  ;;  %v1161_v2 = vld [vmem:[%s1595_s1 + $0x28] sm:$0xff] }
   0x2   :  { %1188 = vmatpush.bf16.msra.mxu3 %v1163_v0  ;;  %153 = vmatpush.bf16.msra.mxu0 %v1163_v0  ;;  %v1160_v3 = vld [vmem:[%s1595_s1 + $0x20] sm:$0xff]  ;;  %v1159_v4 = vld [vmem:[%s1595_s1 + $0x18] sm:$0xff]  ;;  %v1158_v5 = vld [vmem:[%s1595_s1 + $0x10] sm:$0xff] }
   0x3   :  { %v1157_v6 = vld [vmem:[%s1595_s1 + $0x8] sm:$0xff]  ;;  %v1156_v7 = vld [vmem:[%s1595_s1] sm:$0xff]  ;;  %v1279_v8 = vld [vmem:[%s1596_s0 + $0x10] sm:$0xff] }
   0x4   :  { %v1285_v9 = vld [vmem:[%s1596_s0 + $0x18] sm:$0xff]  ;;  %v1291_v10 = vld [vmem:[%s1596_s0 + $0x20] sm:$0xff]  ;;  %v1303_v12 = vld [vmem:[%s1596_s0 + $0x28] sm:$0xff] }
   0x5   :  { %v1297_v11 = vld [vmem:[%s1596_s0] sm:$0xff]  ;;  %v1309_v13 = vld [vmem:[%s1596_s0 + $0x8] sm:$0xff]  ;;  %v1171_v14 = vld [vmem:[%s1597_s2 + $0x38] sm:$0xff] }
   0x6   :  { %1189 = vmatpush.bf16.msra.mxu3 %v1162_v1  ;;  %154 = vmatpush.bf16.msra.mxu0 %v1162_v1  ;;  %v1170_v15 = vld [vmem:[%s1597_s2 + $0x30] sm:$0xff]  ;;  %v1169_v16 = vld [vmem:[%s1597_s2 + $0x28] sm:$0xff]  ;;  %v1168_v17 = vld [vmem:[%s1597_s2 + $0x20] sm:$0xff] }
   0x7   :  { %1196 = vmatpush.bf16.msra.mxu1 %v1171_v14  ;;  %v1327_v18 = vld [vmem:[%s1596_s0 + $0x30] sm:$0xff]  ;;  %v1333_v19 = vld [vmem:[%s1596_s0 + $0x38] sm:$0xff]  ;;  %v1165_v22 = vld [vmem:[%s1597_s2 + $0x8] sm:$0xff] }
   0x8   :  { %v1167_v20 = vld [vmem:[%s1597_s2 + $0x18] sm:$0xff]  ;;  %v1166_v21 = vld [vmem:[%s1597_s2 + $0x10] sm:$0xff]  ;;  %v1164_v23 = vld [vmem:[%s1597_s2] sm:$0xff] }
   0x9   :  { %v1351_v24 = vld [vmem:[%s1598_s5] sm:$0xff] }
   0xa   :  { %1190 = vmatpush.bf16.msra.mxu3 %v1161_v2  ;;  %155 = vmatpush.bf16.msra.mxu0 %v1161_v2  ;;  %v56_v26 = vperm.slane %v1351_v24, 0 }
   0xb   :  { %1197 = vmatpush.bf16.msra.mxu1 %v1170_v15 }
   0xe   :  { %1191 = vmatpush.bf16.msra.mxu3 %v1160_v3  ;;  %156 = vmatpush.bf16.msra.mxu0 %v1160_v3 }
   0xf   :  { %1198 = vmatpush.bf16.msra.mxu1 %v1169_v16 }
  0x12   :  { %1192 = vmatpush.bf16.msra.mxu3 %v1159_v4  ;;  %157 = vmatpush.bf16.msra.mxu0 %v1159_v4 }
  0x13   :  { %1199 = vmatpush.bf16.msra.mxu1 %v1168_v17 }
  0x16   :  { %1193 = vmatpush.bf16.msra.mxu3 %v1158_v5  ;;  %158 = vmatpush.bf16.msra.mxu0 %v1158_v5 }
  0x17   :  { %1200 = vmatpush.bf16.msra.mxu1 %v1167_v20 }
  0x1a   :  { %1194 = vmatpush.bf16.msra.mxu3 %v1157_v6  ;;  %159 = vmatpush.bf16.msra.mxu0 %v1157_v6 }
  0x1b   :  { %1201 = vmatpush.bf16.msra.mxu1 %v1166_v21 }
  0x1e   :  { %1195 = vmatpush.bf16.msra.mxu3 %v1156_v7  ;;  %160 = vmatpush.bf16.msra.mxu0 %v1156_v7 }
  0x1f   :  { %1202 = vmatpush.bf16.msra.mxu1 %v1165_v22 }
  0x21   :  { %171 = vmatmul.bf16.vlgmr.msra.gmra.mxu3 %v1279_v8  ;;  %161 = vmatmul.bf16.vlgmr.msra.gmra.mxu0 %v1297_v11 }
  0x22   :  { %290 = vmatpush.bf16.msrb.mxu0 %v1171_v14 }
  0x23   :  { %1203 = vmatpush.bf16.msra.mxu1 %v1164_v23 }
  0x26   :  { %291 = vmatpush.bf16.msrb.mxu0 %v1170_v15 }
  0x2a   :  { %292 = vmatpush.bf16.msrb.mxu0 %v1169_v16 }
  0x2e   :  { %293 = vmatpush.bf16.msrb.mxu0 %v1168_v17 }
  0x31   :  { %176 = vmatmul.bf16.gmra.mxu3 %v1285_v9  ;;  %166 = vmatmul.bf16.gmra.mxu0 %v1309_v13 }
  0x32   :  { %294 = vmatpush.bf16.msrb.mxu0 %v1167_v20 }
  0x36   :  { %295 = vmatpush.bf16.msrb.mxu0 %v1166_v21 }
  0x3a   :  { %296 = vmatpush.bf16.msrb.mxu0 %v1165_v22 }
  0x3e   :  { %297 = vmatpush.bf16.msrb.mxu0 %v1164_v23 }
  0x41   :  { %181 = vmatmul.bf16.gmra.mxu3 %v1291_v10 }
  0x51   :  { %186 = vmatmul.bf16.gmra.mxu3 %v1303_v12 }
  0x61   :  { %191 = vmatmul.bf16.gmra.mxu3 %v1327_v18 }
  0x71   :  { %196 = vmatmul.bf16.gmra.mxu3 %v1333_v19 }
  0x9e   :  { %v162_v41 = vpop.f32.mrf.mxu0 }
  0x9f   :  { %v163_v47 = vadd.f32 %v162_v41, %v56_v26 }
  0xa1   :  { %v202_v51 = vmax.f32 %v163_v47, 0.0 }
  0xa4   :  { %v172_v25 = vpop.f32.mrf.mxu3 }
  0xa5   :  { %v173_v27 = vadd.f32 %v172_v25, %v56_v26 }
  0xa6   :  { %v164_v49 = vpop.f32.mrf.mxu0 }
  0xa7   :  { %v206_v30 = vmax.f32 %v173_v27, 0.0  ;;  %v165_v52 = vadd.f32 %v164_v49, %v56_v26 }
  0xa9   :  { %v203_v53 = vmax.f32 %v165_v52, 0.0  ;;  %v1178_v52 = vld [vmem:[%s1599_s3 + $0x30] sm:$0xff] }
  0xab   :  { %v218_v54 = vpack.c.bf16 %v203_v53, %v202_v51  ;;  %v1179_v51 = vld [vmem:[%s1599_s3 + $0x38] sm:$0xff]  ;;  %v1177_v53 = vld [vmem:[%s1599_s3 + $0x28] sm:$0xff] }
  0xac   :  { %v174_v28 = vpop.f32.mrf.mxu3  ;;  %485 = vmatpush.bf16.msrb.mxu3 %v1179_v51 }
  0xad   :  { %v175_v29 = vadd.f32 %v174_v28, %v56_v26  ;;  %298 = vmatmul.bf16.vlgmr.msrb.gmra.mxu0 %v218_v54  ;;  %v1176_v54 = vld [vmem:[%s1599_s3 + $0x20] sm:$0xff] }
  0xae   :  { %v167_v56 = vpop.f32.mrf.mxu0 }
  0xaf   :  { %v207_v31 = vmax.f32 %v175_v29, 0.0  ;;  %v168_v61 = vadd.f32 %v167_v56, %v56_v26  ;;  %v1174_v56 = vld [vmem:[%s1599_s3 + $0x10] sm:$0xff] }
  0xb0   :  { %486 = vmatpush.bf16.msrb.mxu3 %v1178_v52 }
  0xb1   :  { %v220_v32 = vpack.c.bf16 %v207_v31, %v206_v30  ;;  %v204_v1 = vmax.f32 %v168_v61, 0.0 }
  0xb3   :  { %308 = vmatmul.bf16.vlgmr.msra.gmra.mxu1 %v220_v32 }
  0xb4   :  { %v177_v33 = vpop.f32.mrf.mxu3  ;;  %487 = vmatpush.bf16.msrb.mxu3 %v1177_v53 }
  0xb5   :  { %v178_v34 = vadd.f32 %v177_v33, %v56_v26 }
  0xb6   :  { %v169_v63 = vpop.f32.mrf.mxu0 }
  0xb7   :  { %v208_v37 = vmax.f32 %v178_v34, 0.0  ;;  %v170_v2 = vadd.f32 %v169_v63, %v56_v26 }
  0xb8   :  { %488 = vmatpush.bf16.msrb.mxu3 %v1176_v54 }
  0xb9   :  { %v205_v3 = vmax.f32 %v170_v2, 0.0 }
  0xbb   :  { %v219_v4 = vpack.c.bf16 %v205_v3, %v204_v1 }
  0xbc   :  { %v179_v35 = vpop.f32.mrf.mxu3 }
  0xbd   :  { %v180_v36 = vadd.f32 %v179_v35, %v56_v26  ;;  %303 = vmatmul.bf16.gmra.mxu0 %v219_v4 }
  0xbf   :  { %v209_v38 = vmax.f32 %v180_v36, 0.0 }
  0xc1   :  { %v221_v39 = vpack.c.bf16 %v209_v38, %v208_v37 }
  0xc3   :  { %313 = vmatmul.bf16.gmra.mxu1 %v221_v39 }
  0xc4   :  { %v182_v40 = vpop.f32.mrf.mxu3 }
  0xc5   :  { %v183_v42 = vadd.f32 %v182_v40, %v56_v26 }
  0xc7   :  { %v210_v45 = vmax.f32 %v183_v42, 0.0 }
  0xcc   :  { %v184_v43 = vpop.f32.mrf.mxu3 }
  0xcd   :  { %v185_v44 = vadd.f32 %v184_v43, %v56_v26 }
  0xcf   :  { %v211_v46 = vmax.f32 %v185_v44, 0.0 }
  0xd1   :  { %v222_v48 = vpack.c.bf16 %v211_v46, %v210_v45 }
  0xd3   :  { %318 = vmatmul.bf16.gmra.mxu1 %v222_v48 }
  0xd4   :  { %v187_v50 = vpop.f32.mrf.mxu3 }
  0xd5   :  { %v188_v55 = vadd.f32 %v187_v50, %v56_v26 }
  0xd7   :  { %v212_v59 = vmax.f32 %v188_v55, 0.0  ;;  %v1175_v55 = vld [vmem:[%s1599_s3 + $0x18] sm:$0xff] }
  0xd8   :  { %489 = vmatpush.bf16.msrb.mxu3 %v1175_v55 }
  0xdc   :  { %v189_v57 = vpop.f32.mrf.mxu3  ;;  %490 = vmatpush.bf16.msrb.mxu3 %v1174_v56 }
  0xdd   :  { %v190_v58 = vadd.f32 %v189_v57, %v56_v26  ;;  %v1173_v57 = vld [vmem:[%s1599_s3 + $0x8] sm:$0xff] }
  0xdf   :  { %v213_v60 = vmax.f32 %v190_v58, 0.0  ;;  %v1172_v58 = vld [vmem:[%s1599_s3] sm:$0xff] }
  0xe0   :  { %491 = vmatpush.bf16.msrb.mxu3 %v1173_v57 }
  0xe1   :  { %v223_v62 = vpack.c.bf16 %v213_v60, %v212_v59  ;;  %v347_v60 = vperm.slane %v1351_v24, 1 }
  0xe3   :  { %323 = vmatmul.bf16.gmra.mxu1 %v223_v62 }
  0xe4   :  { %v192_v0 = vpop.f32.mrf.mxu3  ;;  %492 = vmatpush.bf16.msrb.mxu3 %v1172_v58 }
  0xe5   :  { %v193_v5 = vadd.f32 %v192_v0, %v56_v26 }
  0xe7   :  { %v214_v14 = vmax.f32 %v193_v5, 0.0 }
  0xec   :  { %v194_v6 = vpop.f32.mrf.mxu3 }
  0xed   :  { %v195_v7 = vadd.f32 %v194_v6, %v56_v26 }
  0xef   :  { %v215_v15 = vmax.f32 %v195_v7, 0.0 }
  0xf1   :  { %v224_v16 = vpack.c.bf16 %v215_v15, %v214_v14 }
  0xf3   :  { %328 = vmatmul.bf16.gmra.mxu1 %v224_v16 }
  0xf4   :  { %v197_v17 = vpop.f32.mrf.mxu3 }
  0xf5   :  { %v198_v20 = vadd.f32 %v197_v17, %v56_v26 }
  0xf7   :  { %v216_v23 = vmax.f32 %v198_v20, 0.0 }
  0xfc   :  { %v199_v21 = vpop.f32.mrf.mxu3 }
  0xfd   :  { %v200_v22 = vadd.f32 %v199_v21, %v56_v26 }
  0xff   :  { %v217_v25 = vmax.f32 %v200_v22, 0.0 }
 0x101   :  { %v225_v27 = vpack.c.bf16 %v217_v25, %v216_v23 }
 0x103   :  { %333 = vmatmul.bf16.gmra.mxu1 %v225_v27 }
 0x12a   :  { %v299_v38 = vpop.f32.mrf.mxu0 }
 0x130   :  { %v309_v28 = vpop.f32.mrf.mxu1 }
 0x132   :  { %v301_v42 = vpop.f32.mrf.mxu0 }
 0x133   :  { %v339_v50 = vpack.c.bf16 %v301_v42, %v299_v38 }
 0x138   :  { %v311_v29 = vpop.f32.mrf.mxu1 }
 0x139   :  { %v341_v47 = vpack.c.bf16 %v311_v29, %v309_v28 }
 0x13a   :  { %v304_v44 = vpop.f32.mrf.mxu0 }
 0x140   :  { %v314_v30 = vpop.f32.mrf.mxu1 }
 0x142   :  { %v306_v48 = vpop.f32.mrf.mxu0 }
 0x143   :  { %v340_v49 = vpack.c.bf16 %v306_v48, %v304_v44 }
 0x148   :  { %v316_v31 = vpop.f32.mrf.mxu1 }
 0x149   :  { %v342_v46 = vpack.c.bf16 %v316_v31, %v314_v30 }
 0x150   :  { %v319_v32 = vpop.f32.mrf.mxu1 }
 0x158   :  { %v321_v33 = vpop.f32.mrf.mxu1 }
 0x159   :  { %v343_v45 = vpack.c.bf16 %v321_v33, %v319_v32 }
 0x160   :  { %v324_v34 = vpop.f32.mrf.mxu1 }
 0x168   :  { %v326_v35 = vpop.f32.mrf.mxu1 }
 0x169   :  { %v344_v43 = vpack.c.bf16 %v326_v35, %v324_v34 }
 0x170   :  { %v329_v36 = vpop.f32.mrf.mxu1 }
 0x178   :  { %v331_v37 = vpop.f32.mrf.mxu1 }
 0x179   :  { %v345_v26 = vpack.c.bf16 %v331_v37, %v329_v36 }
 0x180   :  { %v334_v39 = vpop.f32.mrf.mxu1 }
 0x188   :  { %v336_v40 = vpop.f32.mrf.mxu1 }
 0x189   :  { %v346_v41 = vpack.c.bf16 %v336_v40, %v334_v39 }
 0x18b   :  { %348 = vmatpush.bf16.msra.mxu0 %v346_v41  ;;  %1204 = vmatpush.bf16.msra.mxu2 %v346_v41 }
 0x18f   :  { %349 = vmatpush.bf16.msra.mxu0 %v345_v26  ;;  %1205 = vmatpush.bf16.msra.mxu2 %v345_v26 }
 0x193   :  { %350 = vmatpush.bf16.msra.mxu0 %v344_v43  ;;  %1206 = vmatpush.bf16.msra.mxu2 %v344_v43 }
 0x197   :  { %351 = vmatpush.bf16.msra.mxu0 %v343_v45  ;;  %1207 = vmatpush.bf16.msra.mxu2 %v343_v45 }
 0x19b   :  { %352 = vmatpush.bf16.msra.mxu0 %v342_v46  ;;  %1208 = vmatpush.bf16.msra.mxu2 %v342_v46 }
 0x19f   :  { %353 = vmatpush.bf16.msra.mxu0 %v341_v47  ;;  %1209 = vmatpush.bf16.msra.mxu2 %v341_v47 }
 0x1a3   :  { %354 = vmatpush.bf16.msra.mxu0 %v340_v49  ;;  %1210 = vmatpush.bf16.msra.mxu2 %v340_v49 }
 0x1a7   :  { %355 = vmatpush.bf16.msra.mxu0 %v339_v50  ;;  %1211 = vmatpush.bf16.msra.mxu2 %v339_v50 }
 0x1aa   :  { %356 = vmatmul.bf16.vlgmr.msra.gmra.mxu0 %v1297_v11  ;;  %366 = vmatmul.bf16.vlgmr.msra.gmra.mxu2 %v1279_v8 }
 0x1ba   :  { %361 = vmatmul.bf16.gmra.mxu0 %v1309_v13  ;;  %371 = vmatmul.bf16.gmra.mxu2 %v1285_v9 }
 0x1ca   :  { %376 = vmatmul.bf16.gmra.mxu2 %v1291_v10 }
 0x1da   :  { %381 = vmatmul.bf16.gmra.mxu2 %v1303_v12 }
 0x1ea   :  { %386 = vmatmul.bf16.gmra.mxu2 %v1327_v18 }
 0x1fa   :  { %391 = vmatmul.bf16.gmra.mxu2 %v1333_v19 }
 0x227   :  { %v357_v59 = vpop.f32.mrf.mxu0 }
 0x228   :  { %v358_v62 = vadd.f32 %v357_v59, %v347_v60 }
 0x22a   :  { %v397_v1 = vmax.f32 %v358_v62, 0.0 }
 0x22d   :  { %v367_v61 = vpop.f32.mrf.mxu2 }
 0x22e   :  { %v368_v22 = vadd.f32 %v367_v61, %v347_v60 }
 0x22f   :  { %v359_v63 = vpop.f32.mrf.mxu0 }
 0x230   :  { %v360_v0 = vadd.f32 %v359_v63, %v347_v60  ;;  %v401_v25 = vmax.f32 %v368_v22, 0.0 }
 0x232   :  { %v398_v2 = vmax.f32 %v360_v0, 0.0 }
 0x234   :  { %v413_v3 = vpack.c.bf16 %v398_v2, %v397_v1 }
 0x235   :  { %v369_v4 = vpop.f32.mrf.mxu2 }
 0x236   :  { %493 = vmatmul.bf16.vlgmr.msrb.gmra.mxu3 %v413_v3  ;;  %v370_v23 = vadd.f32 %v369_v4, %v347_v60 }
 0x237   :  { %v362_v5 = vpop.f32.mrf.mxu0 }
 0x238   :  { %v363_v6 = vadd.f32 %v362_v5, %v347_v60  ;;  %v402_v27 = vmax.f32 %v370_v23, 0.0 }
 0x23a   :  { %v399_v16 = vmax.f32 %v363_v6, 0.0  ;;  %v415_v29 = vpack.c.bf16 %v402_v27, %v401_v25 }
 0x23d   :  { %v372_v14 = vpop.f32.mrf.mxu2 }
 0x23e   :  { %v373_v30 = vadd.f32 %v372_v14, %v347_v60 }
 0x23f   :  { %v364_v7 = vpop.f32.mrf.mxu0 }
 0x240   :  { %v365_v15 = vadd.f32 %v364_v7, %v347_v60  ;;  %v403_v33 = vmax.f32 %v373_v30, 0.0 }
 0x242   :  { %v400_v17 = vmax.f32 %v365_v15, 0.0 }
 0x244   :  { %v414_v20 = vpack.c.bf16 %v400_v17, %v399_v16 }
 0x245   :  { %v374_v21 = vpop.f32.mrf.mxu2 }
 0x246   :  { %498 = vmatmul.bf16.gmra.mxu3 %v414_v20  ;;  %v375_v31 = vadd.f32 %v374_v21, %v347_v60 }
 0x248   :  { %v404_v34 = vmax.f32 %v375_v31, 0.0  ;;  %v1187_v31 = vld [vmem:[%s1600_s4 + $0x38] sm:$0xff] }
 0x249   :  { %680 = vmatpush.bf16.msrb.mxu1 %v1187_v31 }
 0x24a   :  { %v416_v35 = vpack.c.bf16 %v404_v34, %v403_v33  ;;  %v1185_v33 = vld [vmem:[%s1600_s4 + $0x28] sm:$0xff]  ;;  %v1184_v34 = vld [vmem:[%s1600_s4 + $0x20] sm:$0xff] }
 0x24d   :  { %v377_v28 = vpop.f32.mrf.mxu2 }
 0x24e   :  { %v378_v37 = vadd.f32 %v377_v28, %v347_v60 }
 0x250   :  { %v405_v39 = vmax.f32 %v378_v37, 0.0  ;;  %v1181_v37 = vld [vmem:[%s1600_s4 + $0x8] sm:$0xff] }
 0x255   :  { %v379_v32 = vpop.f32.mrf.mxu2 }
 0x256   :  { %503 = vmatmul.bf16.gmra.mxu3 %v415_v29  ;;  %v380_v38 = vadd.f32 %v379_v32, %v347_v60  ;;  %v1186_v32 = vld [vmem:[%s1600_s4 + $0x30] sm:$0xff] }
 0x257   :  { %681 = vmatpush.bf16.msrb.mxu1 %v1186_v32 }
 0x258   :  { %v406_v40 = vmax.f32 %v380_v38, 0.0  ;;  %v1180_v38 = vld [vmem:[%s1600_s4] sm:$0xff] }
 0x25a   :  { %v417_v42 = vpack.c.bf16 %v406_v40, %v405_v39  ;;  %v542_v40 = vperm.slane %v1351_v24, 2 }
 0x25b   :  { %682 = vmatpush.bf16.msrb.mxu1 %v1185_v33 }
 0x25d   :  { %v382_v36 = vpop.f32.mrf.mxu2 }
 0x25e   :  { %v383_v43 = vadd.f32 %v382_v36, %v347_v60  ;;  %v1182_v36 = vld [vmem:[%s1600_s4 + $0x10] sm:$0xff] }
 0x25f   :  { %683 = vmatpush.bf16.msrb.mxu1 %v1184_v34 }
 0x260   :  { %v407_v45 = vmax.f32 %v383_v43, 0.0 }
 0x265   :  { %v384_v41 = vpop.f32.mrf.mxu2 }
 0x266   :  { %508 = vmatmul.bf16.gmra.mxu3 %v416_v35  ;;  %v385_v44 = vadd.f32 %v384_v41, %v347_v60  ;;  %v1183_v35 = vld [vmem:[%s1600_s4 + $0x18] sm:$0xff] }
 0x267   :  { %684 = vmatpush.bf16.msrb.mxu1 %v1183_v35 }
 0x268   :  { %v408_v46 = vmax.f32 %v385_v44, 0.0 }
 0x26a   :  { %v418_v47 = vpack.c.bf16 %v408_v46, %v407_v45 }
 0x26b   :  { %685 = vmatpush.bf16.msrb.mxu1 %v1182_v36 }
 0x26d   :  { %v387_v26 = vpop.f32.mrf.mxu2 }
 0x26e   :  { %v388_v49 = vadd.f32 %v387_v26, %v347_v60 }
 0x26f   :  { %686 = vmatpush.bf16.msrb.mxu1 %v1181_v37 }
 0x270   :  { %v409_v52 = vmax.f32 %v388_v49, 0.0 }
 0x273   :  { %687 = vmatpush.bf16.msrb.mxu1 %v1180_v38 }
 0x275   :  { %v389_v48 = vpop.f32.mrf.mxu2 }
 0x276   :  { %513 = vmatmul.bf16.gmra.mxu3 %v417_v42  ;;  %v390_v50 = vadd.f32 %v389_v48, %v347_v60 }
 0x278   :  { %v410_v53 = vmax.f32 %v390_v50, 0.0 }
 0x27a   :  { %v419_v54 = vpack.c.bf16 %v410_v53, %v409_v52 }
 0x27d   :  { %v392_v51 = vpop.f32.mrf.mxu2 }
 0x27e   :  { %v393_v56 = vadd.f32 %v392_v51, %v347_v60 }
 0x280   :  { %v411_v58 = vmax.f32 %v393_v56, 0.0 }
 0x285   :  { %v394_v55 = vpop.f32.mrf.mxu2 }
 0x286   :  { %518 = vmatmul.bf16.gmra.mxu3 %v418_v47  ;;  %v395_v57 = vadd.f32 %v394_v55, %v347_v60 }
 0x288   :  { %v412_v59 = vmax.f32 %v395_v57, 0.0 }
 0x28a   :  { %v420_v61 = vpack.c.bf16 %v412_v59, %v411_v58 }
 0x296   :  { %523 = vmatmul.bf16.gmra.mxu3 %v419_v54 }
 0x2a6   :  { %528 = vmatmul.bf16.gmra.mxu3 %v420_v61 }
 0x2b9   :  { %v494_v62 = vpop.f32.mrf.mxu3 }
 0x2c1   :  { %v496_v63 = vpop.f32.mrf.mxu3 }
 0x2c2   :  { %v534_v0 = vpack.c.bf16 %v496_v63, %v494_v62 }
 0x2c9   :  { %v499_v1 = vpop.f32.mrf.mxu3 }
 0x2d1   :  { %v501_v2 = vpop.f32.mrf.mxu3 }
 0x2d2   :  { %v535_v3 = vpack.c.bf16 %v501_v2, %v499_v1 }
 0x2d9   :  { %v504_v4 = vpop.f32.mrf.mxu3 }
 0x2e1   :  { %v506_v5 = vpop.f32.mrf.mxu3 }
 0x2e2   :  { %v536_v6 = vpack.c.bf16 %v506_v5, %v504_v4 }
 0x2e9   :  { %v509_v7 = vpop.f32.mrf.mxu3 }
 0x2f1   :  { %v511_v14 = vpop.f32.mrf.mxu3 }
 0x2f2   :  { %v537_v15 = vpack.c.bf16 %v511_v14, %v509_v7 }
 0x2f9   :  { %v514_v16 = vpop.f32.mrf.mxu3 }
 0x301   :  { %v516_v17 = vpop.f32.mrf.mxu3 }
 0x302   :  { %v538_v30 = vpack.c.bf16 %v516_v17, %v514_v16 }
 0x309   :  { %v519_v20 = vpop.f32.mrf.mxu3 }
 0x311   :  { %v521_v60 = vpop.f32.mrf.mxu3 }
 0x312   :  { %v539_v29 = vpack.c.bf16 %v521_v60, %v519_v20 }
 0x319   :  { %v524_v21 = vpop.f32.mrf.mxu3 }
 0x321   :  { %v526_v22 = vpop.f32.mrf.mxu3 }
 0x322   :  { %v540_v28 = vpack.c.bf16 %v526_v22, %v524_v21 }
 0x329   :  { %v529_v23 = vpop.f32.mrf.mxu3 }
 0x331   :  { %v531_v25 = vpop.f32.mrf.mxu3 }
 0x332   :  { %v541_v27 = vpack.c.bf16 %v531_v25, %v529_v23 }
 0x334   :  { %543 = vmatpush.bf16.msrb.mxu0 %v541_v27 }
 0x338   :  { %544 = vmatpush.bf16.msrb.mxu0 %v540_v28 }
 0x33c   :  { %545 = vmatpush.bf16.msrb.mxu0 %v539_v29 }
 0x340   :  { %546 = vmatpush.bf16.msrb.mxu0 %v538_v30 }
 0x344   :  { %547 = vmatpush.bf16.msrb.mxu0 %v537_v15 }
 0x348   :  { %548 = vmatpush.bf16.msrb.mxu0 %v536_v6 }
 0x34c   :  { %549 = vmatpush.bf16.msrb.mxu0 %v535_v3 }
 0x350   :  { %550 = vmatpush.bf16.msrb.mxu0 %v534_v0 }
 0x353   :  { %551 = vmatmul.bf16.vlgmr.msrb.gmra.mxu0 %v1297_v11 }
 0x363   :  { %556 = vmatmul.bf16.gmra.mxu0 %v1309_v13 }
 0x373   :  { %561 = vmatmul.bf16.gmra.mxu0 %v1279_v8 }
 0x383   :  { %566 = vmatmul.bf16.gmra.mxu0 %v1285_v9 }
 0x393   :  { %571 = vmatmul.bf16.gmra.mxu0 %v1291_v10 }
 0x3a3   :  { %576 = vmatmul.bf16.gmra.mxu0 %v1303_v12 }
 0x3b3   :  { %581 = vmatmul.bf16.gmra.mxu0 %v1327_v18 }
 0x3c3   :  { %586 = vmatmul.bf16.gmra.mxu0 %v1333_v19 }
 0x3d0   :  { %v552_v39 = vpop.f32.mrf.mxu0 }
 0x3d1   :  { %v553_v41 = vadd.f32 %v552_v39, %v542_v40 }
 0x3d3   :  { %v592_v43 = vmax.f32 %v553_v41, 0.0 }
 0x3d8   :  { %v554_v42 = vpop.f32.mrf.mxu0 }
 0x3d9   :  { %v555_v26 = vadd.f32 %v554_v42, %v542_v40 }
 0x3db   :  { %v593_v44 = vmax.f32 %v555_v26, 0.0 }
 0x3dd   :  { %v608_v45 = vpack.c.bf16 %v593_v44, %v592_v43 }
 0x3df   :  { %688 = vmatmul.bf16.vlgmr.msrb.gmra.mxu1 %v608_v45 }
 0x3e0   :  { %v557_v46 = vpop.f32.mrf.mxu0 }
 0x3e1   :  { %v558_v47 = vadd.f32 %v557_v46, %v542_v40 }
 0x3e3   :  { %v594_v50 = vmax.f32 %v558_v47, 0.0 }
 0x3e8   :  { %v559_v48 = vpop.f32.mrf.mxu0 }
 0x3e9   :  { %v560_v49 = vadd.f32 %v559_v48, %v542_v40 }
 0x3eb   :  { %v595_v51 = vmax.f32 %v560_v49, 0.0 }
 0x3ed   :  { %v609_v52 = vpack.c.bf16 %v595_v51, %v594_v50 }
 0x3ef   :  { %693 = vmatmul.bf16.gmra.mxu1 %v609_v52 }
 0x3f0   :  { %v562_v53 = vpop.f32.mrf.mxu0 }
 0x3f1   :  { %v563_v54 = vadd.f32 %v562_v53, %v542_v40 }
 0x3f3   :  { %v596_v57 = vmax.f32 %v563_v54, 0.0 }
 0x3f8   :  { %v564_v55 = vpop.f32.mrf.mxu0 }
 0x3f9   :  { %v565_v56 = vadd.f32 %v564_v55, %v542_v40 }
 0x3fb   :  { %v597_v58 = vmax.f32 %v565_v56, 0.0 }
 0x3fd   :  { %v610_v59 = vpack.c.bf16 %v597_v58, %v596_v57 }
 0x3ff   :  { %698 = vmatmul.bf16.gmra.mxu1 %v610_v59 }
 0x400   :  { %v567_v61 = vpop.f32.mrf.mxu0 }
 0x401   :  { %v568_v62 = vadd.f32 %v567_v61, %v542_v40 }
 0x403   :  { %v598_v1 = vmax.f32 %v568_v62, 0.0 }
 0x408   :  { %v569_v63 = vpop.f32.mrf.mxu0 }
 0x409   :  { %v570_v0 = vadd.f32 %v569_v63, %v542_v40 }
 0x40b   :  { %v599_v2 = vmax.f32 %v570_v0, 0.0 }
 0x40d   :  { %v611_v3 = vpack.c.bf16 %v599_v2, %v598_v1  ;;  %v1429_v1 = vperm.slane %v1351_v24, 3  ;;  %v1432_v2 = vperm.slane %v1351_v24, 4 }
 0x40f   :  { %703 = vmatmul.bf16.gmra.mxu1 %v611_v3 }
 0x410   :  { %v572_v4 = vpop.f32.mrf.mxu0 }
 0x411   :  { %v573_v5 = vadd.f32 %v572_v4, %v542_v40 }
 0x413   :  { %v600_v14 = vmax.f32 %v573_v5, 0.0 }
 0x418   :  { %v574_v6 = vpop.f32.mrf.mxu0 }
 0x419   :  { %v575_v7 = vadd.f32 %v574_v6, %v542_v40 }
 0x41b   :  { %v601_v15 = vmax.f32 %v575_v7, 0.0 }
 0x41d   :  { %v612_v16 = vpack.c.bf16 %v601_v15, %v600_v14 }
 0x41f   :  { %708 = vmatmul.bf16.gmra.mxu1 %v612_v16 }
 0x420   :  { %v577_v17 = vpop.f32.mrf.mxu0 }
 0x421   :  { %v578_v20 = vadd.f32 %v577_v17, %v542_v40 }
 0x423   :  { %v602_v22 = vmax.f32 %v578_v20, 0.0 }
 0x428   :  { %v579_v60 = vpop.f32.mrf.mxu0 }
 0x429   :  { %v580_v21 = vadd.f32 %v579_v60, %v542_v40 }
 0x42b   :  { %v603_v23 = vmax.f32 %v580_v21, 0.0 }
 0x42d   :  { %v613_v25 = vpack.c.bf16 %v603_v23, %v602_v22 }
 0x42f   :  { %713 = vmatmul.bf16.gmra.mxu1 %v613_v25 }
 0x430   :  { %v582_v27 = vpop.f32.mrf.mxu0 }
 0x431   :  { %v583_v28 = vadd.f32 %v582_v27, %v542_v40 }
 0x433   :  { %v604_v31 = vmax.f32 %v583_v28, 0.0 }
 0x438   :  { %v584_v29 = vpop.f32.mrf.mxu0 }
 0x439   :  { %v585_v30 = vadd.f32 %v584_v29, %v542_v40 }
 0x43b   :  { %v605_v32 = vmax.f32 %v585_v30, 0.0 }
 0x43d   :  { %v614_v33 = vpack.c.bf16 %v605_v32, %v604_v31 }
 0x43f   :  { %718 = vmatmul.bf16.gmra.mxu1 %v614_v33 }
 0x440   :  { %v587_v34 = vpop.f32.mrf.mxu0 }
 0x441   :  { %v588_v35 = vadd.f32 %v587_v34, %v542_v40 }
 0x443   :  { %v606_v38 = vmax.f32 %v588_v35, 0.0 }
 0x448   :  { %v589_v36 = vpop.f32.mrf.mxu0 }
 0x449   :  { %v590_v37 = vadd.f32 %v589_v36, %v542_v40 }
 0x44b   :  { %v607_v39 = vmax.f32 %v590_v37, 0.0 }
 0x44d   :  { %v615_v41 = vpack.c.bf16 %v607_v39, %v606_v38 }
 0x44f   :  { %723 = vmatmul.bf16.gmra.mxu1 %v615_v41 }
 0x45c   :  { %v689_v42 = vpop.f32.mrf.mxu1 }
 0x464   :  { %v691_v26 = vpop.f32.mrf.mxu1 }
 0x465   :  { %v729_v43 = vpack.c.bf16 %v691_v26, %v689_v42 }
 0x46c   :  { %v694_v44 = vpop.f32.mrf.mxu1 }
 0x474   :  { %v696_v45 = vpop.f32.mrf.mxu1 }
 0x475   :  { %v730_v46 = vpack.c.bf16 %v696_v45, %v694_v44 }
 0x47c   :  { %v699_v47 = vpop.f32.mrf.mxu1 }
 0x484   :  { %v701_v48 = vpop.f32.mrf.mxu1 }
 0x485   :  { %v731_v49 = vpack.c.bf16 %v701_v48, %v699_v47 }
 0x48c   :  { %v704_v50 = vpop.f32.mrf.mxu1 }
 0x494   :  { %v706_v51 = vpop.f32.mrf.mxu1 }
 0x495   :  { %v732_v52 = vpack.c.bf16 %v706_v51, %v704_v50 }
 0x49c   :  { %v709_v53 = vpop.f32.mrf.mxu1 }
 0x4a4   :  { %v711_v54 = vpop.f32.mrf.mxu1 }
 0x4a5   :  { %v733_v0 = vpack.c.bf16 %v711_v54, %v709_v53  ;;  %v1216_v53 = vmov 0  }
 0x4a6   :  { %1213 = vset.pattern.permute.xlu1 %v1216_v53  ;;  %1215 = vset.pattern.permute.xlu0 %v1216_v53 }
 0x4a7   :  { %1214 = vset.pattern.permute.xlu2 %v1216_v53 }
 0x4ac   :  { %v714_v55 = vpop.f32.mrf.mxu1 }
 0x4b4   :  { %v716_v40 = vpop.f32.mrf.mxu1 }
 0x4b5   :  { %v734_v63 = vpack.c.bf16 %v716_v40, %v714_v55 }
 0x4bc   :  { %v719_v56 = vpop.f32.mrf.mxu1 }
 0x4c4   :  { %v721_v57 = vpop.f32.mrf.mxu1 }
 0x4c5   :  { %v735_v62 = vpack.c.bf16 %v721_v57, %v719_v56 }
 0x4cc   :  { %v724_v58 = vpop.f32.mrf.mxu1 }
 0x4d4   :  { %v726_v59 = vpop.f32.mrf.mxu1 }
 0x4d5   :  { %v736_v61 = vpack.c.bf16 %v726_v59, %v724_v58 }
 0x4d7   :  { %738 = vmatpush.bf16.msrb.mxu2 %v736_v61 }
 0x4db   :  { %739 = vmatpush.bf16.msrb.mxu2 %v735_v62 }
 0x4df   :  { %740 = vmatpush.bf16.msrb.mxu2 %v734_v63 }
 0x4e3   :  { %741 = vmatpush.bf16.msrb.mxu2 %v733_v0 }
 0x4e7   :  { %742 = vmatpush.bf16.msrb.mxu2 %v732_v52 }
 0x4eb   :  { %743 = vmatpush.bf16.msrb.mxu2 %v731_v49 }
 0x4ef   :  { %744 = vmatpush.bf16.msrb.mxu2 %v730_v46 }
 0x4f3   :  { %745 = vmatpush.bf16.msrb.mxu2 %v729_v43 }
 0x4f6   :  { %746 = vmatmul.bf16.vlgmr.msrb.gmra.mxu2 %v1297_v11 }
 0x506   :  { %751 = vmatmul.bf16.gmra.mxu2 %v1309_v13 }
 0x516   :  { %756 = vmatmul.bf16.gmra.mxu2 %v1279_v8 }
 0x526   :  { %761 = vmatmul.bf16.gmra.mxu2 %v1285_v9 }
 0x536   :  { %766 = vmatmul.bf16.gmra.mxu2 %v1291_v10 }
 0x546   :  { %771 = vmatmul.bf16.gmra.mxu2 %v1303_v12 }
 0x556   :  { %776 = vmatmul.bf16.gmra.mxu2 %v1327_v18 }
 0x566   :  { %781 = vmatmul.bf16.gmra.mxu2 %v1333_v19 }
 0x579   :  { %v747_v11 = vpop.f32.mrf.mxu2 }
 0x57a   :  { %v1435_v13 = vadd.f32 %v747_v11, %v1429_v1 }
 0x57c   :  { %v788_v8 = vsub.f32 %v1435_v13, %v1432_v2 }
 0x57e   :  { %v804_v9 = vmul.f32 %v788_v8, %v788_v8 }
 0x580   :  { %820 = vadd.xlane.f32.xlu0 %v804_v9 }
 0x581   :  { %v749_v10 = vpop.f32.mrf.mxu2 }
 0x582   :  { %v1440_v12 = vadd.f32 %v749_v10, %v1429_v1 }
 0x584   :  { %v789_v18 = vsub.f32 %v1440_v12, %v1432_v2 }
 0x586   :  { %v805_v19 = vmul.f32 %v789_v18, %v789_v18 }
 0x588   :  { %822 = vadd.xlane.f32.xlu0 %v805_v19  ;;  %v852_v19 = vperm.slane %v1351_v24, 5 }
 0x589   :  { %v752_v3 = vpop.f32.mrf.mxu2 }
 0x58a   :  { %v1445_v4 = vadd.f32 %v752_v3, %v1429_v1 }
 0x58c   :  { %v790_v5 = vsub.f32 %v1445_v4, %v1432_v2 }
 0x58e   :  { %v806_v6 = vmul.f32 %v790_v5, %v790_v5 }
 0x590   :  { %824 = vadd.xlane.f32.xlu1 %v806_v6 }
 0x591   :  { %v754_v7 = vpop.f32.mrf.mxu2 }
 0x592   :  { %v1450_v14 = vadd.f32 %v754_v7, %v1429_v1 }
 0x594   :  { %v791_v15 = vsub.f32 %v1450_v14, %v1432_v2 }
 0x596   :  { %v807_v16 = vmul.f32 %v791_v15, %v791_v15 }
 0x598   :  { %826 = vadd.xlane.f32.xlu1 %v807_v16 }
 0x599   :  { %v757_v17 = vpop.f32.mrf.mxu2 }
 0x59a   :  { %v1455_v20 = vadd.f32 %v757_v17, %v1429_v1 }
 0x59c   :  { %v792_v60 = vsub.f32 %v1455_v20, %v1432_v2 }
 0x59e   :  { %v808_v21 = vmul.f32 %v792_v60, %v792_v60 }
 0x5a0   :  { %828 = vadd.xlane.f32.xlu2 %v808_v21 }
 0x5a1   :  { %v759_v22 = vpop.f32.mrf.mxu2 }
 0x5a2   :  { %v1460_v23 = vadd.f32 %v759_v22, %v1429_v1 }
 0x5a4   :  { %v793_v25 = vsub.f32 %v1460_v23, %v1432_v2 }
 0x5a6   :  { %v809_v27 = vmul.f32 %v793_v25, %v793_v25 }
 0x5a8   :  { %830 = vadd.xlane.f32.xlu2 %v809_v27 }
 0x5a9   :  { %v762_v28 = vpop.f32.mrf.mxu2 }
 0x5aa   :  { %v1465_v29 = vadd.f32 %v762_v28, %v1429_v1 }
 0x5ac   :  { %v794_v30 = vsub.f32 %v1465_v29, %v1432_v2 }
 0x5ae   :  { %v810_v31 = vmul.f32 %v794_v30, %v794_v30 }
 0x5b0   :  { %832 = vadd.xlane.f32.xlu0 %v810_v31 }
 0x5b1   :  { %v764_v32 = vpop.f32.mrf.mxu2 }
 0x5b2   :  { %v1470_v33 = vadd.f32 %v764_v32, %v1429_v1 }
 0x5b4   :  { %v795_v34 = vsub.f32 %v1470_v33, %v1432_v2 }
 0x5b6   :  { %v811_v35 = vmul.f32 %v795_v34, %v795_v34 }
 0x5b8   :  { %834 = vadd.xlane.f32.xlu1 %v811_v35 }
 0x5b9   :  { %v767_v36 = vpop.f32.mrf.mxu2 }
 0x5ba   :  { %v1475_v37 = vadd.f32 %v767_v36, %v1429_v1 }
 0x5bc   :  { %v796_v38 = vsub.f32 %v1475_v37, %v1432_v2 }
 0x5be   :  { %v812_v39 = vmul.f32 %v796_v38, %v796_v38 }
 0x5c0   :  { %836 = vadd.xlane.f32.xlu2 %v812_v39 }
 0x5c1   :  { %v769_v41 = vpop.f32.mrf.mxu2 }
 0x5c2   :  { %v1480_v42 = vadd.f32 %v769_v41, %v1429_v1 }
 0x5c4   :  { %v797_v26 = vsub.f32 %v1480_v42, %v1432_v2 }
 0x5c6   :  { %v813_v43 = vmul.f32 %v797_v26, %v797_v26 }
 0x5c8   :  { %838 = vadd.xlane.f32.xlu0 %v813_v43 }
 0x5c9   :  { %v772_v44 = vpop.f32.mrf.mxu2 }
 0x5ca   :  { %v1485_v45 = vadd.f32 %v772_v44, %v1429_v1  ;;  %v869_v44 = vlaneseq }
 0x5cc   :  { %v798_v46 = vsub.f32 %v1485_v45, %v1432_v2 }
 0x5ce   :  { %v814_v47 = vmul.f32 %v798_v46, %v798_v46 }
 0x5d0   :  { %840 = vadd.xlane.f32.xlu1 %v814_v47 }
 0x5d1   :  { %v774_v48 = vpop.f32.mrf.mxu2 }
 0x5d2   :  { %v1490_v49 = vadd.f32 %v774_v48, %v1429_v1  ;;  %v870_v48 = vand.u32 127, %v869_v44 }
 0x5d4   :  { %v799_v50 = vsub.f32 %v1490_v49, %v1432_v2  ;;  %vm871_vm0 = vcmp.eq.s32.totalorder %v870_v48, 64 }
 0x5d6   :  { %v815_v51 = vmul.f32 %v799_v50, %v799_v50 }
 0x5d8   :  { %842 = vadd.xlane.f32.xlu2 %v815_v51 }
 0x5d9   :  { %v777_v52 = vpop.f32.mrf.mxu2 }
 0x5da   :  { %v1495_v54 = vadd.f32 %v777_v52, %v1429_v1 }
 0x5dc   :  { %v800_v55 = vsub.f32 %v1495_v54, %v1432_v2 }
 0x5de   :  { %v816_v40 = vmul.f32 %v800_v55, %v800_v55 }
 0x5e0   :  { %844 = vadd.xlane.f32.xlu0 %v816_v40 }
 0x5e1   :  { %v779_v56 = vpop.f32.mrf.mxu2 }
 0x5e2   :  { %v1500_v57 = vadd.f32 %v779_v56, %v1429_v1 }
 0x5e4   :  { %v801_v58 = vsub.f32 %v1500_v57, %v1432_v2 }
 0x5e6   :  { %v817_v59 = vmul.f32 %v801_v58, %v801_v58 }
 0x5e8   :  { %846 = vadd.xlane.f32.xlu1 %v817_v59 }
 0x5e9   :  { %v782_v61 = vpop.f32.mrf.mxu2 }
 0x5ea   :  { %v1505_v62 = vadd.f32 %v782_v61, %v1429_v1 }
 0x5ec   :  { %v802_v63 = vsub.f32 %v1505_v62, %v1432_v2 }
 0x5ee   :  { %v818_v0 = vmul.f32 %v802_v63, %v802_v63 }
 0x5f0   :  { %848 = vadd.xlane.f32.xlu2 %v818_v0 }
 0x5f1   :  { %v784_v11 = vpop.f32.mrf.mxu2 }
 0x5f2   :  { %v1510_v8 = vadd.f32 %v784_v11, %v1429_v1 }
 0x5f3   :  { %v821_v18 = vpop.xlane.xlu0 %820 }
 0x5f4   :  { %v803_v9 = vsub.f32 %v1510_v8, %v1432_v2  ;;  %v853_v3 = vsub.f32 %v821_v18, %v852_v19 }
 0x5f6   :  { %v819_v10 = vmul.f32 %v803_v9, %v803_v9 }
 0x5f8   :  { %850 = vadd.xlane.f32.xlu0 %v819_v10 }
 0x5fb   :  { %v823_v6 = vpop.xlane.xlu0 %822 }
 0x5fc   :  { %v854_v7 = vsub.f32 %v823_v6, %v852_v19 }
 0x601   :  { %874 = vperm.xlu1 %1213, %v853_v3  }
 0x603   :  { %v825_v5 = vpop.xlane.xlu1 %824 }
 0x604   :  { %v855_v15 = vsub.f32 %v825_v5, %v852_v19 }
 0x608   :  { %879 = vperm.xlu2 %1214, %v854_v7  }
 0x60b   :  { %v827_v16 = vpop.xlane.xlu1 %826 }
 0x60c   :  { %884 = vperm.xlu0 %1215, %v855_v15   ;;  %v856_v17 = vsub.f32 %v827_v16, %v852_v19 }
 0x610   :  { %889 = vperm.xlu2 %1214, %v856_v17  }
 0x613   :  { %v829_v1 = vpop.xlane.xlu2 %828 }
 0x614   :  { %v857_v60 = vsub.f32 %v829_v1, %v852_v19 }
 0x616   :  { %894 = vperm.xlu1 %1213, %v857_v60  }
 0x61b   :  { %v831_v2 = vpop.xlane.xlu2 %830 }
 0x61c   :  { %v858_v21 = vsub.f32 %v831_v2, %v852_v19 }
 0x61e   :  { %899 = vperm.xlu2 %1214, %v858_v21  }
 0x623   :  { %v833_v22 = vpop.xlane.xlu0 %832 }
 0x624   :  { %v859_v25 = vsub.f32 %v833_v22, %v852_v19 }
 0x626   :  { %904 = vperm.xlu1 %1213, %v859_v25  }
 0x62b   :  { %v835_v24 = vpop.xlane.xlu1 %834 }
 0x62c   :  { %v860_v27 = vsub.f32 %v835_v24, %v852_v19 }
 0x62e   :  { %909 = vperm.xlu2 %1214, %v860_v27  }
 0x633   :  { %v837_v28 = vpop.xlane.xlu2 %836 }
 0x634   :  { %v861_v30 = vsub.f32 %v837_v28, %v852_v19 }
 0x636   :  { %914 = vperm.xlu1 %1213, %v861_v30  }
 0x63b   :  { %v839_v31 = vpop.xlane.xlu0 %838 }
 0x63c   :  { %v862_v32 = vsub.f32 %v839_v31, %v852_v19 }
 0x63e   :  { %919 = vperm.xlu0 %1215, %v862_v32  }
 0x643   :  { %v841_v34 = vpop.xlane.xlu1 %840 }
 0x644   :  { %v863_v35 = vsub.f32 %v841_v34, %v852_v19 }
 0x646   :  { %924 = vperm.xlu2 %1214, %v863_v35  }
 0x64b   :  { %v843_v36 = vpop.xlane.xlu2 %842 }
 0x64c   :  { %v864_v38 = vsub.f32 %v843_v36, %v852_v19 }
 0x64e   :  { %929 = vperm.xlu1 %1213, %v864_v38  }
 0x653   :  { %v845_v39 = vpop.xlane.xlu0 %844 }
 0x654   :  { %v865_v41 = vsub.f32 %v845_v39, %v852_v19 }
 0x656   :  { %934 = vperm.xlu0 %1215, %v865_v41  }
 0x65b   :  { %v847_v26 = vpop.xlane.xlu1 %846 }
 0x65c   :  { %v866_v43 = vsub.f32 %v847_v26, %v852_v19 }
 0x65e   :  { %939 = vperm.xlu2 %1214, %v866_v43  }
 0x663   :  { %v849_v46 = vpop.xlane.xlu2 %848 }
 0x664   :  { %v867_v47 = vsub.f32 %v849_v46, %v852_v19 }
 0x666   :  { %944 = vperm.xlu1 %1213, %v867_v47  }
 0x66b   :  { %v880_v50 = vpop.permute.xlu2 %879  ;;  %v851_v51 = vpop.xlane.xlu0 %850 }
 0x66c   :  { %v953_v52 = vsel %vm871_vm0, %v880_v50, %v1440_v12  ;;  %v868_v53 = vsub.f32 %v851_v51, %v852_v19 }
 0x66d   :  { %969 = vst [vmem:[%s1601_s6 + $0x8] sm:$0xff] %v953_v52 }
 0x66e   :  { %949 = vperm.xlu0 %1215, %v868_v53  }
 0x673   :  { %v875_v55 = vpop.permute.xlu1 %874  ;;  %v890_v40 = vpop.permute.xlu2 %889 }
 0x674   :  { %v952_v56 = vsel %vm871_vm0, %v875_v55, %v1435_v13  ;;  %v955_v58 = vsel %vm871_vm0, %v890_v40, %v1450_v14 }
 0x675   :  { %968 = vst [vmem:[%s1601_s6] sm:$0xff] %v952_v56 }
 0x676   :  { %971 = vst [vmem:[%s1601_s6 + $0x18] sm:$0xff] %v955_v58 }
 0x67b   :  { %v900_v12 = vpop.permute.xlu2 %899 }
 0x67c   :  { %v957_v59 = vsel %vm871_vm0, %v900_v12, %v1460_v23 }
 0x67d   :  { %973 = vst [vmem:[%s1601_s6 + $0x28] sm:$0xff] %v957_v59 }
 0x67e   :  { %v885_v13 = vpop.permute.xlu0 %884 }
 0x67f   :  { %v954_v14 = vsel %vm871_vm0, %v885_v13, %v1445_v4 }
 0x680   :  { %970 = vst [vmem:[%s1601_s6 + $0x10] sm:$0xff] %v954_v14 }
 0x688   :  { %v895_v61 = vpop.permute.xlu1 %894  ;;  %v910_v63 = vpop.permute.xlu2 %909 }
 0x689   :  { %v956_v0 = vsel %vm871_vm0, %v895_v61, %v1455_v20  ;;  %v959_v23 = vsel %vm871_vm0, %v910_v63, %v1470_v33 }
 0x68a   :  { %972 = vst [vmem:[%s1601_s6 + $0x20] sm:$0xff] %v956_v0 }
 0x68b   :  { %975 = vst [vmem:[%s1601_s6 + $0x38] sm:$0xff] %v959_v23 }
 0x698   :  { %v905_v4 = vpop.permute.xlu1 %904 }
 0x699   :  { %v958_v11 = vsel %vm871_vm0, %v905_v4, %v1465_v29 }
 0x69a   :  { %974 = vst [vmem:[%s1601_s6 + $0x30] sm:$0xff] %v958_v11 }
 0x6a0   :  { %v925_v20 = vpop.permute.xlu2 %924 }
 0x6a1   :  { %v962_v33 = vsel %vm871_vm0, %v925_v20, %v1485_v45 }
 0x6a2   :  { %978 = vst [vmem:[%s1601_s6 + $0x50] sm:$0xff] %v962_v33 }
 0x6a8   :  { %v915_v9 = vpop.permute.xlu1 %914 }
 0x6a9   :  { %v960_v10 = vsel %vm871_vm0, %v915_v9, %v1475_v37 }
 0x6aa   :  { %976 = vst [vmem:[%s1601_s6 + $0x40] sm:$0xff] %v960_v10 }
 0x6b0   :  { %v920_v29 = vpop.permute.xlu0 %919 }
 0x6b1   :  { %v961_v18 = vsel %vm871_vm0, %v920_v29, %v1480_v42 }
 0x6b2   :  { %977 = vst [vmem:[%s1601_s6 + $0x48] sm:$0xff] %v961_v18 }
 0x6b8   :  { %v940_v45 = vpop.permute.xlu2 %939 }
 0x6b9   :  { %v965_v19 = vsel %vm871_vm0, %v940_v45, %v1500_v57 }
 0x6ba   :  { %981 = vst [vmem:[%s1601_s6 + $0x68] sm:$0xff] %v965_v19 }
 0x6c0   :  { %v930_v37 = vpop.permute.xlu1 %929 }
 0x6c1   :  { %v963_v3 = vsel %vm871_vm0, %v930_v37, %v1490_v49 }
 0x6c2   :  { %979 = vst [vmem:[%s1601_s6 + $0x58] sm:$0xff] %v963_v3 }
 0x6c8   :  { %v935_v42 = vpop.permute.xlu0 %934 }
 0x6c9   :  { %v964_v5 = vsel %vm871_vm0, %v935_v42, %v1495_v54 }
 0x6ca   :  { %980 = vst [vmem:[%s1601_s6 + $0x60] sm:$0xff] %v964_v5 }
 0x6d8   :  { %v945_v57 = vpop.permute.xlu1 %944 }
 0x6d9   :  { %v966_v6 = vsel %vm871_vm0, %v945_v57, %v1505_v62 }
 0x6da   :  { %982 = vst [vmem:[%s1601_s6 + $0x70] sm:$0xff] %v966_v6 }
 0x6e0   :  { %v950_v49 = vpop.permute.xlu0 %949 }
 0x6e1   :  { %v967_v7 = vsel %vm871_vm0, %v950_v49, %v1510_v8 }
 0x6e2   :  { %983 = vst [vmem:[%s1601_s6 + $0x78] sm:$0xff] %v967_v7 }

</bundles_post_ra>
